<compile_context>
chip_gen: v7x
topology: tpu7x:2x2x1
jax: 0.10.0
libtpu: 0.0.40
codegen_flags: <defaults>
</compile_context>

<pallas_src>
import jax
import jax.numpy as jnp
from jax.experimental import pallas as pl
from jax.experimental.pallas import tpu as pltpu


def _round_up(x, m):
    return ((x + m - 1) // m) * m


# ----------------------------------------------------------------------------
# Fused kernel: for one batch tile, run every layer (tanh(h @ W + b)) back to
# back, writing the post-encoder activation to enc_ref and the final
# activation to dec_ref.  The running activation `h` stays on-chip.
# ----------------------------------------------------------------------------
def _make_fused_kernel(n_layers, n_enc, compute_dtype):
    def kernel(*refs):
        x_ref = refs[0]
        enc_ref = refs[1 + 2 * n_layers]
        dec_ref = refs[2 + 2 * n_layers]

        h = x_ref[...]                                        # (TB, Fpad) bf16
        for li in range(n_layers):                            # statically unrolled
            w_ref = refs[1 + 2 * li]                          # (Fpad, Fpad) bf16
            b_ref = refs[2 + 2 * li]                          # (1, Fpad)    f32
            y = jnp.dot(h, w_ref[...],
                        preferred_element_type=jnp.float32)   # MXU, f32 acc
            y = y + b_ref[...]                                # f32 epilogue
            a = jnp.tanh(y)                                   # f32 (v5e-safe)
            if li == n_enc - 1:
                enc_ref[...] = a.astype(enc_ref.dtype)
            if li == n_layers - 1:
                dec_ref[...] = a.astype(dec_ref.dtype)
            h = a.astype(compute_dtype)                       # bf16 for next dot

    return kernel


# ----------------------------------------------------------------------------
# Parameter construction (deterministic, mirrors nn.Linear default init)
# ----------------------------------------------------------------------------
def init_linear_params(key, in_feats, out_feats):
    # PyTorch nn.Linear default: U(-1/sqrt(in), 1/sqrt(in)) for weight and bias.
    kw, kb = jax.random.split(key)
    bound = 1.0 / jnp.sqrt(jnp.float32(in_feats))
    w = jax.random.uniform(kw, (out_feats, in_feats), jnp.float32, -bound, bound)
    b = jax.random.uniform(kb, (out_feats,), jnp.float32, -bound, bound)
    return w, b  # stored in PyTorch (out, in) layout


class AutoEncoderPallas:
    """JAX/Pallas port of the PyTorch AutoEncoder.

    encoder dims: [in_dim, *layers]           (Linear + tanh per step)
    decoder dims: reversed([in_dim, *layers]) (Linear + tanh per step)
    forward(x) -> (encoded, decoded)
    """

    def __init__(self, in_dim, layers=(16,), seed=0,
                 compute_dtype=jnp.bfloat16, batch_tile=512):
        dims = [in_dim, *layers]
        rev = list(reversed(dims))
        self.in_dim = in_dim
        self.hidden_dim = dims[-1]
        self.n_enc = len(dims) - 1
        self.n_layers = 2 * self.n_enc
        self.compute_dtype = compute_dtype
        self.batch_tile = batch_tile
        # Lane-dense common padded feature width (all dims padded to this).
        self.Fpad = max(128, _round_up(max(dims), 128))

        key = jax.random.PRNGKey(seed)
        keys = jax.random.split(key, self.n_layers)
        shapes = list(zip(dims[:-1], dims[1:])) + list(zip(rev[:-1], rev[1:]))

        self.enc_params = []   # original (out,in) f32 params, for the reference
        self.dec_params = []
        self.packed = []       # (w_pad (Fpad,Fpad) bf16, b_pad (1,Fpad) f32)
        for li, (fin, fout) in enumerate(shapes):
            w, b = init_linear_params(keys[li], fin, fout)
            if li < self.n_enc:
                self.enc_params.append((w, b))
            else:
                self.dec_params.append((w, b))
            # Precompute transposed + zero-padded kernel operands ONCE.
            w_pad = jnp.zeros((self.Fpad, self.Fpad), jnp.float32)
            w_pad = w_pad.at[:fin, :fout].set(w.T)
            b_pad = jnp.zeros((1, self.Fpad), jnp.float32)
            b_pad = b_pad.at[0, :fout].set(b)
            self.packed.append((w_pad.astype(compute_dtype), b_pad))

    def forward(self, x):
        B, D = x.shape
        assert D == self.in_dim
        Fpad = self.Fpad

        # Batch tile: multiple of 8 sublanes, as large as requested/needed.
        TB = max(8, min(self.batch_tile, _round_up(B, 8)))
        B_pad = _round_up(B, TB)

        xp = jnp.zeros((B_pad, Fpad), self.compute_dtype)
        xp = xp.at[:B, :D].set(x.astype(self.compute_dtype))

        grid = (B_pad // TB,)

        in_specs = [pl.BlockSpec((TB, Fpad), lambda i: (i, 0))]
        operands = [xp]
        for w_pad, b_pad in self.packed:
            in_specs.append(pl.BlockSpec((Fpad, Fpad), lambda i: (0, 0)))
            in_specs.append(pl.BlockSpec((1, Fpad), lambda i: (0, 0)))
            operands.extend([w_pad, b_pad])

        out_specs = (pl.BlockSpec((TB, Fpad), lambda i: (i, 0)),
                     pl.BlockSpec((TB, Fpad), lambda i: (i, 0)))
        out_shape = (jax.ShapeDtypeStruct((B_pad, Fpad), jnp.float32),
                     jax.ShapeDtypeStruct((B_pad, Fpad), jnp.float32))

        # VMEM budget: double-buffered x tile + two f32 output tiles, plus the
        # (grid-resident) padded weights/biases.  Sized so v7x's 64 MiB is safe.
        cb = jnp.dtype(self.compute_dtype).itemsize
        tile_bytes = 2 * (TB * Fpad * cb + 2 * TB * Fpad * 4) + \
            2 * sum(Fpad * Fpad * cb + Fpad * 4 for _ in self.packed)
        vmem_limit = int(min(max(2 * tile_bytes, 8 << 20), 48 << 20))

        kernel = _make_fused_kernel(self.n_layers, self.n_enc, self.compute_dtype)
        enc_pad, dec_pad = pl.pallas_call(
            kernel,
            out_shape=out_shape,
            grid=grid,
            in_specs=in_specs,
            out_specs=out_specs,
            compiler_params=pltpu.CompilerParams(
                dimension_semantics=("parallel",),   # shard batch tiles on v7x
                vmem_limit_bytes=vmem_limit,
            ),
        )(*operands)

        encoded = enc_pad[:B, :self.hidden_dim]
        decoded = dec_pad[:B, :self.in_dim]
        return encoded, decoded

    # TODO(synk): training utilities (MSELoss / Adam optimizer held by the
    # PyTorch module) are not part of the forward pass and are not ported.


# Pure-JAX f32 reference for a sanity check.
def _reference_forward(model, x):
    h = x
    for w, b in model.enc_params:
        h = jnp.tanh(h @ w.T + b)
    enc = h
    for w, b in model.dec_params:
        h = jnp.tanh(h @ w.T + b)
    return enc, h


if __name__ == "__main__":
    batch, in_dim, hidden = 8, 32, 16
    model = AutoEncoderPallas(in_dim, layers=(hidden,), seed=0)

    x = jax.random.normal(jax.random.PRNGKey(0), (batch, in_dim), jnp.float32)

    fwd = jax.jit(model.forward)
    encoded, decoded = fwd(x)
    jax.block_until_ready((encoded, decoded))

    enc_ref, dec_ref = _reference_forward(model, x)
    assert encoded.shape == (batch, hidden)
    assert decoded.shape == (batch, in_dim)
    # bf16 inputs / f32 accumulation: allow a small absolute tolerance.
    assert jnp.allclose(encoded, enc_ref, atol=3e-2, rtol=0.0)
    assert jnp.allclose(decoded, dec_ref, atol=3e-2, rtol=0.0)

    print("KERNEL_OK")
</pallas_src>

<mosaic_0001>
module attributes {stable_mosaic.version = 11 : i64} {
  func.func @kernel(%arg0: i32, %arg1: memref<8x128xbf16, #tpu.memory_space<vmem>>, %arg2: memref<128x128xbf16, #tpu.memory_space<vmem>>, %arg3: memref<1x128xf32, #tpu.memory_space<vmem>>, %arg4: memref<128x128xbf16, #tpu.memory_space<vmem>>, %arg5: memref<1x128xf32, #tpu.memory_space<vmem>>, %arg6: memref<8x128xf32, #tpu.memory_space<vmem>>, %arg7: memref<8x128xf32, #tpu.memory_space<vmem>>) attributes {dimension_semantics = [#tpu.dimension_semantics<parallel>], iteration_bounds = array<i64: 1>, scalar_prefetch = 0 : i64, scratch_operands = 0 : i64, tpu.core_type = #tpu.core_type<tc>, window_params = [{transform_indices = @transform_0, window_bounds = array<i64: 8, 128>}, {pipeline_mode = #tpu.pipeline_mode<synchronous>, transform_indices = @transform_1, window_bounds = array<i64: 128, 128>}, {pipeline_mode = #tpu.pipeline_mode<synchronous>, transform_indices = @transform_2, window_bounds = array<i64: 1, 128>}, {pipeline_mode = #tpu.pipeline_mode<synchronous>, transform_indices = @transform_3, window_bounds = array<i64: 128, 128>}, {pipeline_mode = #tpu.pipeline_mode<synchronous>, transform_indices = @transform_4, window_bounds = array<i64: 1, 128>}, {transform_indices = @transform_5, window_bounds = array<i64: 8, 128>}, {transform_indices = @transform_6, window_bounds = array<i64: 8, 128>}]} {
    %c0 = arith.constant 0 : index
    %c0_0 = arith.constant 0 : index
    %0 = vector.load %arg1[%c0, %c0_0] : memref<8x128xbf16, #tpu.memory_space<vmem>>, vector<8x128xbf16>
    %c0_1 = arith.constant 0 : index
    %c0_2 = arith.constant 0 : index
    %1 = vector.load %arg2[%c0_1, %c0_2] : memref<128x128xbf16, #tpu.memory_space<vmem>>, vector<128x128xbf16>
    %cst = arith.constant dense<0.000000e+00> : vector<8x128xf32>
    %2 = tpu.matmul %0, %1, %cst {dimension_numbers = #tpu.dot_dimension_numbers<[1], [0], [0], [1], [0, 0, 1, 1], [], []>} : vector<8x128xbf16>, vector<128x128xbf16>, vector<8x128xf32> -> vector<8x128xf32>
    %c0_3 = arith.constant 0 : index
    %c0_4 = arith.constant 0 : index
    %3 = vector.load %arg3[%c0_3, %c0_4] : memref<1x128xf32, #tpu.memory_space<vmem>>, vector<1x128xf32>
    %4 = vector.broadcast %3 : vector<1x128xf32> to vector<8x128xf32>
    %5 = arith.addf %2, %4 : vector<8x128xf32>
    %6 = math.tanh %5 : vector<8x128xf32>
    %c0_5 = arith.constant 0 : index
    %c0_6 = arith.constant 0 : index
    %7 = vector.load %arg6[%c0_5, %c0_6] : memref<8x128xf32, #tpu.memory_space<vmem>>, vector<8x128xf32>
    tpu.vector_store %arg6[%c0_5, %c0_6], %6 {strides = array<i32>} : memref<8x128xf32, #tpu.memory_space<vmem>>, vector<8x128xf32>,
    %8 = arith.truncf %6 : vector<8x128xf32> to vector<8x128xbf16>
    %c0_7 = arith.constant 0 : index
    %c0_8 = arith.constant 0 : index
    %9 = vector.load %arg4[%c0_7, %c0_8] : memref<128x128xbf16, #tpu.memory_space<vmem>>, vector<128x128xbf16>
    %cst_9 = arith.constant dense<0.000000e+00> : vector<8x128xf32>
    %10 = tpu.matmul %8, %9, %cst_9 {dimension_numbers = #tpu.dot_dimension_numbers<[1], [0], [0], [1], [0, 0, 1, 1], [], []>} : vector<8x128xbf16>, vector<128x128xbf16>, vector<8x128xf32> -> vector<8x128xf32>
    %c0_10 = arith.constant 0 : index
    %c0_11 = arith.constant 0 : index
    %11 = vector.load %arg5[%c0_10, %c0_11] : memref<1x128xf32, #tpu.memory_space<vmem>>, vector<1x128xf32>
    %12 = vector.broadcast %11 : vector<1x128xf32> to vector<8x128xf32>
    %13 = arith.addf %10, %12 : vector<8x128xf32>
    %14 = math.tanh %13 : vector<8x128xf32>
    %c0_12 = arith.constant 0 : index
    %c0_13 = arith.constant 0 : index
    %15 = vector.load %arg7[%c0_12, %c0_13] : memref<8x128xf32, #tpu.memory_space<vmem>>, vector<8x128xf32>
    tpu.vector_store %arg7[%c0_12, %c0_13], %14 {strides = array<i32>} : memref<8x128xf32, #tpu.memory_space<vmem>>, vector<8x128xf32>,
    return
  }
  func.func @transform_0(%arg0: i32) -> (i32, i32) {
    %c0_i32 = arith.constant 0 : i32
    %c0_i32_0 = arith.constant 0 : i32
    return %arg0, %c0_i32 : i32, i32
  }
  func.func @transform_1(%arg0: i32) -> (i32, i32) {
    %c0_i32 = arith.constant 0 : i32
    %c0_i32_0 = arith.constant 0 : i32
    %c0_i32_1 = arith.constant 0 : i32
    return %c0_i32, %c0_i32_0 : i32, i32
  }
  func.func @transform_2(%arg0: i32) -> (i32, i32) {
    %c0_i32 = arith.constant 0 : i32
    %c0_i32_0 = arith.constant 0 : i32
    %c0_i32_1 = arith.constant 0 : i32
    return %c0_i32, %c0_i32_0 : i32, i32
  }
  func.func @transform_3(%arg0: i32) -> (i32, i32) {
    %c0_i32 = arith.constant 0 : i32
    %c0_i32_0 = arith.constant 0 : i32
    %c0_i32_1 = arith.constant 0 : i32
    return %c0_i32, %c0_i32_0 : i32, i32
  }
  func.func @transform_4(%arg0: i32) -> (i32, i32) {
    %c0_i32 = arith.constant 0 : i32
    %c0_i32_0 = arith.constant 0 : i32
    %c0_i32_1 = arith.constant 0 : i32
    return %c0_i32, %c0_i32_0 : i32, i32
  }
  func.func @transform_5(%arg0: i32) -> (i32, i32) {
    %c0_i32 = arith.constant 0 : i32
    %c0_i32_0 = arith.constant 0 : i32
    return %arg0, %c0_i32 : i32, i32
  }
  func.func @transform_6(%arg0: i32) -> (i32, i32) {
    %c0_i32 = arith.constant 0 : i32
    %c0_i32_0 = arith.constant 0 : i32
    return %arg0, %c0_i32 : i32, i32
  }
}

</mosaic_0001>

<bundles_post_ra>
// kernel: forward.1
= control target key start
LH: loop header
LB: loop body
LE: loop exit
PB: predicated region body
PF: predicated region fallthrough
CT: control target
= control target key end

     0   :  { %12 = vsyncpa [#allocation3], 0  ;;  %s611_s0 = inlined_call_operand.vmem [shape: bf16[8,128], index: 0, kind: input, shape index: {}]   ;;  %s612_s1 = inlined_call_operand.hbm [shape: bf16[128,128], index: 1, kind: input, shape index: {}]   ;;  %s613_s2 = inlined_call_operand.vmem [shape: f32[1,128], index: 2, kind: input, shape index: {}]   ;;  %s614_s3 = inlined_call_operand.hbm [shape: bf16[128,128], index: 3, kind: input, shape index: {}]   ;;  %s615_s4 = inlined_call_operand.vmem [shape: f32[1,128], index: 4, kind: input, shape index: {}]   ;;  %s616_s5 = inlined_call_operand.hbm [shape: f32[8,128], index: 5, kind: output, shape index: {0}]   ;;  %s617_s6 = inlined_call_operand.hbm [shape: f32[8,128], index: 6, kind: output, shape index: {1}]  }
   0x1   :  { %13 = vsyncpa [#allocation6], 0 }
   0x2   :  { %14 = vsyncpa [#allocation4], 0 }
   0x3   :  { %15 = vsyncpa [#allocation9], 0  ;;  %s511_s21 = smov [#allocation2]   ;;  %s415_s25 = scalar_lea.hbm %s612_s1, 1024 }
   0x4   :  { %s23_s22 = sshll.u32 %s511_s21, 4  ;;  %p416_p0 = scmp.ne.s32.totalorder %s612_s1, %s415_s25  ;;  %s24_s22 = int_to_ptr.vmem [resolvable:$true] %s23_s22 }
   0x5   :  { %p419_p1 = scmp.lt.u32.totalorder %s415_s25, %s612_s1 }
   0x7   :  { %p421_p2 = pnand %p419_p1, %p416_p0 }
   0x9   :  { %424 = shalt.err (!%p421_p2)
}
   0xa   :  { %s425_s30 = scalar_lea.vmem %s24_s22, 1024  ;;  %p430_p4 = scmp.lt.s32.totalorder %s24_s22, %s24_s22 }
   0xb   :  { %p426_p3 = scmp.ne.s32.totalorder %s24_s22, %s425_s30  ;;  %p431_p5 = scmp.lt.s32.totalorder %s425_s30, %s425_s30 }
   0xd   :  { %p432_p6 = por %p431_p5, %p430_p4 }
   0xf   :  { %p433_p7 = pnand %p432_p6, %p426_p3 }
  0x11   :  { %436 = shalt.err (!%p433_p7)
}
  0x12   :  { %s512_s7 = smov 64   ;;  %s513_s8 = smov 4  }
  0x13   :  { %29 = dma.hbm_to_vmem [thread:$0]  %s612_s1, 1024, %s24_s22, [#allocation3], %s512_s7, %s512_s7, %s513_s8  }
  0x14   :  { %s514_s11 = smov [#allocation5]   ;;  %s437_s15 = scalar_lea.hbm %s614_s3, 1024 }
  0x15   :  { %s37_s12 = sshll.u32 %s514_s11, 4  ;;  %p438_p8 = scmp.ne.s32.totalorder %s614_s3, %s437_s15  ;;  %s38_s12 = int_to_ptr.vmem [resolvable:$true] %s37_s12 }
  0x16   :  { %p441_p9 = scmp.lt.u32.totalorder %s437_s15, %s614_s3 }
  0x18   :  { %p443_p10 = pnand %p441_p9, %p438_p8 }
  0x1a   :  { %446 = shalt.err (!%p443_p10)
}
  0x1b   :  { %s447_s20 = scalar_lea.vmem %s38_s12, 1024  ;;  %p452_p12 = scmp.lt.s32.totalorder %s38_s12, %s38_s12 }
  0x1c   :  { %p448_p11 = scmp.ne.s32.totalorder %s38_s12, %s447_s20  ;;  %p453_p13 = scmp.lt.s32.totalorder %s447_s20, %s447_s20 }
  0x1e   :  { %p454_p0 = por %p453_p13, %p452_p12 }
  0x20   :  { %p455_p1 = pnand %p454_p0, %p448_p11 }
  0x22   :  { %458 = shalt.err (!%p455_p1)
}
  0x23   :  { %43 = dma.hbm_to_vmem [thread:$0]  %s614_s3, 1024, %s38_s12, [#allocation6], %s512_s7, %s512_s7, %s513_s8  }
  0x24   :  { %503 = dma.done.wait [#allocation3], 1024  }
  0x25   :  { %504 = vsyncadd [#allocation3], 4294966272 }
  0x26   :  { %505 = dma.done.wait [#allocation6], 1024  }
  0x27   :  { %506 = vsyncadd [#allocation6], 4294966272  ;;  %v515_v0 = vmov 0.0   ;;  %vm516_vm0 = vmmov 0   ;;  %v395_v1 = vld [vmem:[#allocation2] sm:$0xff]   ;;  %v396_v2 = vld [vmem:[#allocation2 + $0x8] sm:$0xff]  }
  0x28   :  { %347 = vmatprep.subr.bf16.mxu0 %v515_v0  ;;  %363 = vmatprep.mubr.msk.bf16.mxu0 %vm516_vm0, %v515_v0  ;;  %v397_v3 = vld [vmem:[#allocation2 + $0x10] sm:$0xff]   ;;  %v403_v4 = vld [vmem:[#allocation5] sm:$0xff]   ;;  %v398_v5 = vld [vmem:[#allocation2 + $0x18] sm:$0xff]  }
  0x29   :  { %367 = vmatprep.subr.bf16.mxu1 %v515_v0  ;;  %383 = vmatprep.mubr.msk.bf16.mxu1 %vm516_vm0, %v515_v0  ;;  %v404_v6 = vld [vmem:[#allocation5 + $0x8] sm:$0xff]   ;;  %v399_v7 = vld [vmem:[#allocation2 + $0x20] sm:$0xff]   ;;  %v405_v8 = vld [vmem:[#allocation5 + $0x10] sm:$0xff]  }
  0x2a   :  { %348 = vmatpush3.bf16.msra.mxu0 %v395_v1  ;;  %368 = vmatpush3.bf16.msra.mxu1 %v403_v4  ;;  %v400_v9 = vld [vmem:[#allocation2 + $0x28] sm:$0xff]   ;;  %v406_v10 = vld [vmem:[#allocation5 + $0x18] sm:$0xff]   ;;  %v401_v11 = vld [vmem:[#allocation2 + $0x30] sm:$0xff]  }
  0x2b   :  { %349 = vmatprep.subr.bf16.mxu0 %v515_v0  ;;  %369 = vmatprep.subr.bf16.mxu1 %v515_v0  ;;  %v402_v12 = vld [vmem:[#allocation2 + $0x38] sm:$0xff]   ;;  %v53_v13 = vld [vmem:[%s611_s0] sm:$0xf]  ;;  %v408_v15 = vld [vmem:[#allocation5 + $0x28] sm:$0xff]   ;;  %s517_s0 = smov [#allocation7]  }
  0x2c   :  { %v407_v14 = vld [vmem:[#allocation5 + $0x20] sm:$0xff]   ;;  %v409_v16 = vld [vmem:[#allocation5 + $0x30] sm:$0xff]   ;;  %v410_v17 = vld [vmem:[#allocation5 + $0x38] sm:$0xff]   ;;  %s287_s25 = sshll.u32 %s517_s0, 4  ;;  %s288_s25 = int_to_ptr.vmem [resolvable:$true] %s287_s25 }
  0x2d   :  { %v311_v18 = vld [vmem:[%s613_s2] ss:$0 sm:$0xff]  ;;  %s459_s26 = scalar_lea.vmem %s288_s25, 128  ;;  %p464_p3 = scmp.lt.s32.totalorder %s288_s25, %s288_s25 }
  0x2e   :  { %350 = vmatpush3.bf16.msra.mxu0 %v396_v2  ;;  %370 = vmatpush3.bf16.msra.mxu1 %v404_v6  ;;  %p460_p2 = scmp.ne.s32.totalorder %s288_s25, %s459_s26  ;;  %p465_p4 = scmp.lt.s32.totalorder %s459_s26, %s459_s26 }
  0x2f   :  { %351 = vmatprep.subr.bf16.mxu0 %v515_v0  ;;  %371 = vmatprep.subr.bf16.mxu1 %v515_v0 }
  0x30   :  { %p466_p5 = por %p465_p4, %p464_p3 }
  0x32   :  { %352 = vmatpush3.bf16.msra.mxu0 %v397_v3  ;;  %372 = vmatpush3.bf16.msra.mxu1 %v405_v8  ;;  %p467_p6 = pnand %p466_p5, %p460_p2 }
  0x33   :  { %353 = vmatprep.subr.bf16.mxu0 %v515_v0  ;;  %373 = vmatprep.subr.bf16.mxu1 %v515_v0 }
  0x36   :  { %354 = vmatpush3.bf16.msra.mxu0 %v398_v5  ;;  %374 = vmatpush3.bf16.msra.mxu1 %v406_v10 }
  0x37   :  { %355 = vmatprep.subr.bf16.mxu0 %v515_v0  ;;  %375 = vmatprep.subr.bf16.mxu1 %v515_v0 }
  0x3a   :  { %356 = vmatpush3.bf16.msra.mxu0 %v399_v7  ;;  %376 = vmatpush3.bf16.msra.mxu1 %v407_v14 }
  0x3b   :  { %357 = vmatprep.subr.bf16.mxu0 %v515_v0  ;;  %377 = vmatprep.subr.bf16.mxu1 %v515_v0 }
  0x3e   :  { %358 = vmatpush3.bf16.msra.mxu0 %v400_v9  ;;  %378 = vmatpush3.bf16.msra.mxu1 %v408_v15 }
  0x3f   :  { %359 = vmatprep.subr.bf16.mxu0 %v515_v0  ;;  %379 = vmatprep.subr.bf16.mxu1 %v515_v0 }
  0x42   :  { %360 = vmatpush3.bf16.msra.mxu0 %v401_v11  ;;  %380 = vmatpush3.bf16.msra.mxu1 %v409_v16 }
  0x43   :  { %361 = vmatprep.subr.bf16.mxu0 %v515_v0  ;;  %381 = vmatprep.subr.bf16.mxu1 %v515_v0 }
  0x46   :  { %362 = vmatpush3.bf16.msra.mxu0 %v402_v12  ;;  %382 = vmatpush3.bf16.msra.mxu1 %v410_v17 }
  0x49   :  { %364 = vmatmul.mubr.bf16.vlgmr.msra.gmra.mrb[0].mxu0 %v53_v13 }
 0x11c   :  { %v159_v19 = vpop.f32.mrb[0].mxu0 }
 0x11d   :  { %v160_v20 = vadd.f32 %v311_v18, %v159_v19  ;;  %v365_v21 = vpop.f32.mrb[1].mxu0 }
 0x11e   :  { %v162_v22 = vpop.f32.mrb[2].mxu0 }
 0x11f   :  { %411 = vtanh.f32 %v160_v20  ;;  %v366_v23 = vpop.f32.mrb[3].mxu0 }
 0x129   :  { %v412_v24 = vpop.eup %411 }
 0x12a   :  { %166 = vst [vmem:[#allocation7] sm:$0xff] %v412_v24  ;;  %v167_v25 = vpack.c.bf16 %v412_v24, %v412_v24 }
 0x12c   :  { %384 = vmatmul.mubr.bf16.vlgmr.msra.gmra.mrb[0].mxu1 %v167_v25 }
 0x12d   :  { %470 = shalt.err (!%p467_p6)
}
 0x12e   :  { %s471_s28 = scalar_lea.hbm %s616_s5, 128 }
 0x12f   :  { %p472_p7 = scmp.ne.s32.totalorder %s616_s5, %s471_s28  ;;  %p475_p8 = scmp.lt.u32.totalorder %s471_s28, %s616_s5 }
 0x131   :  { %p477_p9 = pnand %p475_p8, %p472_p7 }
 0x133   :  { %480 = shalt.err (!%p477_p9)
}
 0x134   :  { %290 = dma.vmem_to_hbm [thread:$0]  %s288_s25, 128, %s616_s5, [#allocation4]   ;;  %v320_v26 = vld [vmem:[%s615_s4] ss:$0 sm:$0xff] }
 0x135   :  { %s518_s13 = smov [#allocation8]  }
 0x136   :  { %s297_s14 = sshll.u32 %s518_s13, 4  ;;  %s298_s14 = int_to_ptr.vmem [resolvable:$true] %s297_s14 }
 0x137   :  { %s481_s15 = scalar_lea.vmem %s298_s14, 128  ;;  %p486_p11 = scmp.lt.s32.totalorder %s298_s14, %s298_s14 }
 0x138   :  { %p482_p10 = scmp.ne.s32.totalorder %s298_s14, %s481_s15  ;;  %p487_p12 = scmp.lt.s32.totalorder %s481_s15, %s481_s15 }
 0x13a   :  { %p488_p13 = por %p487_p12, %p486_p11 }
 0x13c   :  { %p489_p0 = pnand %p488_p13, %p482_p10 }
 0x1ff   :  { %v273_v27 = vpop.f32.mrb[0].mxu1 }
 0x200   :  { %v274_v28 = vadd.f32 %v320_v26, %v273_v27  ;;  %v385_v29 = vpop.f32.mrb[1].mxu1 }
 0x201   :  { %v276_v30 = vpop.f32.mrb[2].mxu1 }
 0x202   :  { %413 = vtanh.f32 %v274_v28  ;;  %v386_v31 = vpop.f32.mrb[3].mxu1 }
 0x20c   :  { %v414_v32 = vpop.eup %413 }
 0x20d   :  { %280 = vst [vmem:[#allocation8] sm:$0xff] %v414_v32 }
 0x20e   :  { %492 = shalt.err (!%p489_p0)
}
 0x20f   :  { %s493_s16 = scalar_lea.hbm %s617_s6, 128 }
 0x210   :  { %p494_p1 = scmp.ne.s32.totalorder %s617_s6, %s493_s16  ;;  %p497_p2 = scmp.lt.u32.totalorder %s493_s16, %s617_s6 }
 0x212   :  { %p499_p3 = pnand %p497_p2, %p494_p1 }
 0x214   :  { %502 = shalt.err (!%p499_p3)
}
 0x215   :  { %300 = dma.vmem_to_hbm [thread:$0]  %s298_s14, 128, %s617_s6, [#allocation9]  }
 0x216   :  { %507 = dma.done.wait [#allocation4], 128  }
 0x217   :  { %508 = vsyncadd [#allocation4], 4294967168 }
 0x218   :  { %509 = dma.done.wait [#allocation9], 128  }
 0x219   :  { %510 = vsyncadd [#allocation9], 4294967168 }
 0x21a   :  { %307 = vsyncpa [#allocation3], 1 }
 0x21b   :  { %308 = vsyncpa [#allocation6], 1 }
 0x21c   :  { %309 = vsyncpa [#allocation4], 1 }
 0x21d   :  { %310 = vsyncpa [#allocation9], 1 }

</bundles_post_ra>
